<compile_context>
chip_gen: v5e
topology: v5e:2x2
jax: 0.10.0
libtpu: 0.0.40
codegen_flags: <defaults>
</compile_context>

<pallas_src>
import math

import jax
import jax.numpy as jnp
from jax.experimental import pallas as pl
from jax.experimental.pallas import tpu as pltpu


# ----------------------------- Pallas kernel -------------------------------
def _make_critic_head_kernel(block_k, weights_resident):
    def kernel(x1_ref, x2_ref, w1a_ref, w1b_ref, b1_ref, w2t_ref, b2_ref,
               o_ref, acc_ref):
        k = pl.program_id(1)

        @pl.when(k == 0)
        def _():
            # Seed the f32 accumulator with the first-layer bias (bias add is
            # free).  NOTE: this relies on the reduction axis k being the
            # innermost (fastest-varying) grid axis; do not reorder the grid.
            acc_ref[...] = jnp.broadcast_to(b1_ref[...], acc_ref.shape)

        if weights_resident:
            # Full (V, H) halves live in VMEM (constant index_map); slice the
            # current K chunk in-kernel.
            off = k * block_k
            if block_k % 128 == 0:
                off = pl.multiple_of(off, 128)
            w1a = w1a_ref[pl.ds(off, block_k), :]
            w1b = w1b_ref[pl.ds(off, block_k), :]
        else:
            w1a = w1a_ref[...]
            w1b = w1b_ref[...]

        # Cast streamed activations to bf16 here (no standalone HBM convert
        # pass in the wrapper); accumulate in f32.
        x1 = x1_ref[...].astype(jnp.bfloat16)
        x2 = x2_ref[...].astype(jnp.bfloat16)
        # Two separate accumulation statements: avoids materializing a second
        # (rows, H) f32 temporary and lets the MXU result path accumulate in
        # place (v7x MRB).
        acc_ref[...] += jnp.dot(x1, w1a, preferred_element_type=jnp.float32)
        acc_ref[...] += jnp.dot(x2, w1b, preferred_element_type=jnp.float32)

        @pl.when(k == pl.num_programs(1) - 1)
        def _():
            h = jnp.maximum(acc_ref[...], 0.0)                       # ReLU (VPU)
            # Linear(H -> 1): VPU multiply + lane reduction instead of a
            # degenerate one-output-column MXU matmul.  b2 comes from SMEM.
            val = jnp.sum(h * w2t_ref[...], axis=-1, keepdims=True) + b2_ref[0, 0]
            # TODO(synk): output stays a (rows, 1) column (1-lane masked vst);
            # a lane-dense (1, rows) slab would shave a few more % of store
            # overhead at the cost of an in-kernel transpose.
            o_ref[...] = jax.nn.sigmoid(val)

    return kernel


# ------------------------------ tiling helpers ------------------------------
def _round_up(x, m):
    return ((x + m - 1) // m) * m


def _pick_block_k(v, target):
    """Largest multiple of 128 that divides v and is <= target (or v itself)."""
    if v <= target:
        return v
    if v % 128 == 0:
        t = (target // 128) * 128
        while t >= 128:
            if v % t == 0:
                return t
            t -= 128
    # Fail fast instead of silently using one enormous K block.
    raise ValueError(
        f"vocab dim {v} cannot be K-tiled in multiples of 128; pad the vocab "
        f"axis of the logits and W1 to a multiple of 128 upstream.")


def _device_vmem_bytes():
    """Per-TensorCore VMEM capacity heuristic (conservative when unknown)."""
    try:
        kind = jax.devices()[0].device_kind.lower()
    except Exception:
        kind = ""
    if "v7" in kind:
        return 64 * 1024 * 1024
    if any(t in kind for t in ("v4", "v5", "v6")):
        return 128 * 1024 * 1024
    return 64 * 1024 * 1024


def split_critic_w1(w1, vocab):
    """Split Linear(2V,H) weight into per-logits halves, cast to bf16 ONCE.

    Do this at parameter-setup time (not per forward call).
    """
    assert w1.shape[0] == 2 * vocab
    return (jnp.asarray(w1[:vocab], jnp.bfloat16),
            jnp.asarray(w1[vocab:], jnp.bfloat16))


# ------------------------------ fused head call ------------------------------
def critic_head(critic_logits, policy_logits, w1a, w1b, b1, w2, b2, *,
                block_rows=None, block_k=None, weights_resident=None):
    """Fused nn.Sequential(Linear(2V,H), ReLU, Linear(H,1), Sigmoid).

    critic_logits / policy_logits: (N, V) rows, logically concatenated along
    the feature axis (critic first) but never materialized.
    w1a / w1b: (V, H) halves of the first-layer weight (pre-split, bf16).
    b1: (1, H), w2: (H, 1), b2: (1, 1).

    NOTE: activations and W1 are consumed in bf16 on the MXU (f32
    accumulation) — a deliberate, documented approximation vs. the f32
    PyTorch reference.
    """
    n, v = critic_logits.shape
    assert policy_logits.shape == (n, v)
    vw, hidden = w1a.shape
    assert vw == v and w1b.shape == (v, hidden)

    vmem_cap = _device_vmem_bytes()
    weight_bytes = 2 * v * hidden * 2  # both bf16 halves
    if weights_resident is None:
        # Pin W1 in VMEM on 128-MiB parts when it fits with headroom for the
        # double-buffered activation slabs; stream it per-K-chunk on v7x.
        weights_resident = (vmem_cap >= 128 * 1024 * 1024
                            and weight_bytes <= 24 * 1024 * 1024)

    if block_k is None:
        block_k = _pick_block_k(v, 2048)
    assert block_k <= v and v % block_k == 0

    if block_rows is None:
        n16 = _round_up(n, 16)
        if n16 >= 32:
            # >=2 row tiles so both v7x TensorCores get work; cap at 512 to
            # keep the f32 activation slabs inside the VMEM budget.
            block_rows = min(512, _round_up((n16 + 1) // 2, 16))
        else:
            block_rows = n16
    block_rows = max(16, _round_up(block_rows, 16))

    # Pad rows instead of silently using one enormous tile when N is not a
    # multiple of the row tile.  Zero rows are sliced off after the call.
    n_pad = _round_up(n, block_rows)
    if n_pad != n:
        pad = ((0, n_pad - n), (0, 0))
        critic_logits = jnp.pad(critic_logits, pad)
        policy_logits = jnp.pad(policy_logits, pad)

    grid = (n_pad // block_rows, v // block_k)

    # Small operands: f32 bias / second-layer weight, scalar b2 in SMEM.
    b1 = b1.reshape(1, hidden).astype(jnp.float32)
    w2t = w2.reshape(1, hidden).astype(jnp.float32)     # (H,1) -> (1,H)
    b2 = b2.reshape(1, 1).astype(jnp.float32)
    w1a = w1a.astype(jnp.bfloat16)                      # no-op if already bf16
    w1b = w1b.astype(jnp.bfloat16)

    x_spec = pl.BlockSpec((block_rows, block_k), lambda i, k: (i, k))
    if weights_resident:
        # Constant index_map -> fetched from HBM once, resident across grid.
        w_spec = pl.BlockSpec((v, hidden), lambda i, k: (0, 0))
    else:
        w_spec = pl.BlockSpec((block_k, hidden), lambda i, k: (k, 0))

    # ~56 MiB on 64-MiB parts (v7x), ~112 MiB on 128-MiB parts (v4/v5e/v6e).
    vmem_limit = min((vmem_cap * 7) // 8, 112 * 1024 * 1024)

    out = pl.pallas_call(
        _make_critic_head_kernel(block_k, weights_resident),
        out_shape=jax.ShapeDtypeStruct((n_pad, 1), jnp.float32),
        grid_spec=pltpu.PrefetchScalarGridSpec(
            num_scalar_prefetch=0,
            grid=grid,
            in_specs=[
                x_spec,                                               # critic logits
                x_spec,                                               # policy logits
                w_spec,                                               # W1[:V]
                w_spec,                                               # W1[V:]
                pl.BlockSpec((1, hidden), lambda i, k: (0, 0)),       # b1
                pl.BlockSpec((1, hidden), lambda i, k: (0, 0)),       # w2^T
                pl.BlockSpec(memory_space=pltpu.MemorySpace.SMEM),    # b2 scalar
            ],
            out_specs=pl.BlockSpec((block_rows, 1), lambda i, k: (i, 0)),
            scratch_shapes=[pltpu.VMEM((block_rows, hidden), jnp.float32)],
        ),
        compiler_params=pltpu.CompilerParams(
            dimension_semantics=("parallel", "arbitrary"),
            vmem_limit_bytes=vmem_limit,
        ),
    )(critic_logits, policy_logits, w1a, w1b, b1, w2t, b2)
    return out[:n]


# --------------------------- stand-in PLM (glue) ----------------------------
# TODO(synk): self.model / self.critic_model are arbitrary user-supplied
# pretrained LMs; there is no concrete spec to translate, so a deterministic
# toy logits producer with the same interface/shapes is used.
def toy_plm_logits(params, input_ids, attention_mask, labels):
    emb = params["emb"][input_ids]                                    # (B, S, D)
    m = attention_mask[..., None].astype(jnp.float32)
    pooled = (emb * m).sum(axis=1) / jnp.maximum(m.sum(axis=1), 1.0)  # (B, D)
    lab = params["emb"][labels]                                       # (B, L, D)
    h = lab + pooled[:, None, :]                                      # (B, L, D)
    return h @ params["w_vocab"]                                      # (B, L, V)


# ------------------------------- A2C forward --------------------------------
def a2c_forward(params, input_ids, attention_mask, explanation,
                explanation_mask, labels):
    # policy branch
    policy_logits = toy_plm_logits(params, input_ids, attention_mask, labels)
    policy = policy_logits                                            # action logits

    # critic branch: concat ids/masks along the sequence dim
    critic_input = jnp.concatenate([input_ids, explanation], axis=-1)
    critic_mask = jnp.concatenate([attention_mask, explanation_mask], axis=-1)
    critic_logits = toy_plm_logits(params, critic_input, critic_mask, labels)

    B, L, V = policy_logits.shape
    # Critic head on the logical concat [critic_logits, policy_logits] along
    # the vocab axis; the concat is never materialized — the kernel consumes
    # both logits tensors directly.  W1 halves are pre-split / pre-cast once.
    value = critic_head(
        critic_logits.reshape(B * L, V),
        policy_logits.reshape(B * L, V),
        params["w1a"], params["w1b"], params["b1"], params["w2"], params["b2"],
    )
    return policy, value.reshape(B, L, 1)


def init_params(key, vocab_size, d_model, critic_hidden):
    k1, k2, k3, k4, k5, k6 = jax.random.split(key, 6)
    fan1 = 2 * vocab_size
    bound1 = 1.0 / math.sqrt(fan1)
    bound2 = 1.0 / math.sqrt(critic_hidden)
    w1 = jax.random.uniform(k3, (fan1, critic_hidden), jnp.float32,
                            minval=-bound1, maxval=bound1)
    w1a, w1b = split_critic_w1(w1, vocab_size)          # pre-split, bf16, ONCE
    return {
        "emb": 0.02 * jax.random.normal(k1, (vocab_size, d_model), jnp.float32),
        "w_vocab": 0.02 * jax.random.normal(k2, (d_model, vocab_size), jnp.float32),
        # critic head: Linear(2V, H), ReLU, Linear(H, 1), Sigmoid
        "w1": w1,                                        # f32 reference copy
        "w1a": w1a,
        "w1b": w1b,
        "b1": jax.random.uniform(k4, (1, critic_hidden), jnp.float32,
                                 minval=-bound1, maxval=bound1),
        "w2": jax.random.uniform(k5, (critic_hidden, 1), jnp.float32,
                                 minval=-bound2, maxval=bound2),
        "b2": jax.random.uniform(k6, (1, 1), jnp.float32,
                                 minval=-bound2, maxval=bound2),
    }


if __name__ == "__main__":
    # Small but non-trivial shapes: B*L = 48 rows -> two row tiles (+ padding
    # path), exercising the multi-tile row grid used for v7x TC sharding.
    B, S, S_EXP, L = 2, 8, 8, 24
    # H=256 fills the 2x256 MXU on v6e/v7x (v5e already full at 128).
    VOCAB, D_MODEL, CRITIC_HIDDEN = 128, 32, 256

    key = jax.random.PRNGKey(0)
    kp, k1, k2, k3 = jax.random.split(key, 4)

    params = init_params(kp, VOCAB, D_MODEL, CRITIC_HIDDEN)

    input_ids = jax.random.randint(k1, (B, S), 0, VOCAB, dtype=jnp.int32)
    explanation = jax.random.randint(k2, (B, S_EXP), 0, VOCAB, dtype=jnp.int32)
    labels = jax.random.randint(k3, (B, L), 0, VOCAB, dtype=jnp.int32)
    attention_mask = jnp.ones((B, S), dtype=jnp.float32)
    explanation_mask = jnp.ones((B, S_EXP), dtype=jnp.float32)

    policy, value = jax.jit(a2c_forward)(
        params, input_ids, attention_mask, explanation, explanation_mask, labels
    )
    jax.block_until_ready((policy, value))

    # ---- numerical check of the Pallas critic head vs plain f32 jnp --------
    crit_lg = toy_plm_logits(
        params, jnp.concatenate([input_ids, explanation], -1),
        jnp.concatenate([attention_mask, explanation_mask], -1), labels)
    pol_lg = toy_plm_logits(params, input_ids, attention_mask, labels)
    feats = jnp.concatenate([crit_lg, pol_lg], axis=-1).reshape(B * L, 2 * VOCAB)
    ref = jax.nn.sigmoid(
        jnp.maximum(feats @ params["w1"] + params["b1"], 0.0) @ params["w2"]
        + params["b2"]
    ).reshape(B, L, 1)
    assert policy.shape == (B, L, VOCAB)
    assert value.shape == (B, L, 1)
    assert jnp.allclose(value, ref, atol=2e-3), "Pallas critic head mismatch"

    # ---- extra check: multi-step (rows x K) grid, row padding, and BOTH
    # weight modes (K-streamed for v7x, VMEM-resident for v4/v5e/v6e) --------
    kx = jax.random.split(jax.random.PRNGKey(1), 6)
    N2, V2, H2 = 40, 256, 256          # N2 % 16 != 0 -> exercises row padding
    xa = 0.1 * jax.random.normal(kx[0], (N2, V2), jnp.float32)
    xb = 0.1 * jax.random.normal(kx[1], (N2, V2), jnp.float32)
    w1t = 0.05 * jax.random.normal(kx[2], (2 * V2, H2), jnp.float32)
    b1t = 0.05 * jax.random.normal(kx[3], (1, H2), jnp.float32)
    w2v = 0.05 * jax.random.normal(kx[4], (H2, 1), jnp.float32)
    b2t = 0.05 * jax.random.normal(kx[5], (1, 1), jnp.float32)
    w1ta, w1tb = split_critic_w1(w1t, V2)
    want = jax.nn.sigmoid(
        jnp.maximum(jnp.concatenate([xa, xb], -1) @ w1t + b1t, 0.0) @ w2v + b2t)
    for resident in (False, True):
        got = critic_head(xa, xb, w1ta, w1tb, b1t, w2v, b2t,
                          block_rows=16, block_k=128, weights_resident=resident)
        jax.block_until_ready(got)
        assert got.shape == (N2, 1)
        assert jnp.allclose(got, want, atol=5e-3), \
            f"K-tiled critic head mismatch (weights_resident={resident})"

    print("KERNEL_OK")
</pallas_src>

<mosaic_0001>
module attributes {stable_mosaic.version = 11 : i64} {
  func.func @kernel(%arg0: i32, %arg1: i32, %arg2: memref<32x128xf32, #tpu.memory_space<vmem>>, %arg3: memref<32x128xf32, #tpu.memory_space<vmem>>, %arg4: memref<128x256xbf16, #tpu.memory_space<vmem>>, %arg5: memref<128x256xbf16, #tpu.memory_space<vmem>>, %arg6: memref<1x256xf32, #tpu.memory_space<vmem>>, %arg7: memref<1x256xf32, #tpu.memory_space<vmem>>, %arg8: memref<1x1xf32, #tpu.memory_space<smem>>, %arg9: memref<32x1xf32, #tpu.memory_space<vmem>>, %arg10: memref<32x256xf32, #tpu.memory_space<vmem>>) attributes {dimension_semantics = [#tpu.dimension_semantics<parallel>, #tpu.dimension_semantics<arbitrary>], iteration_bounds = array<i64: 2, 1>, scalar_prefetch = 0 : i64, scratch_operands = 1 : i64, tpu.core_type = #tpu.core_type<tc>, window_params = [{transform_indices = @transform_0, window_bounds = array<i64: 32, 128>}, {transform_indices = @transform_1, window_bounds = array<i64: 32, 128>}, {transform_indices = @transform_2, window_bounds = array<i64: 128, 256>}, {transform_indices = @transform_3, window_bounds = array<i64: 128, 256>}, {pipeline_mode = #tpu.pipeline_mode<synchronous>, transform_indices = @transform_4, window_bounds = array<i64: 1, 256>}, {pipeline_mode = #tpu.pipeline_mode<synchronous>, transform_indices = @transform_5, window_bounds = array<i64: 1, 256>}, {transform_indices = @transform_6, window_bounds = array<i64: 1, 1>}, {transform_indices = @transform_7, window_bounds = array<i64: 32, 1>}]} {
    %c0_i32 = arith.constant 0 : i32
    %0 = arith.cmpi eq, %arg1, %c0_i32 : i32
    %1 = arith.extui %0 : i1 to i32
    %c0_i32_0 = arith.constant 0 : i32
    %2 = arith.cmpi ne, %1, %c0_i32_0 : i32
    scf.if %2 {
      %c0_19 = arith.constant 0 : index
      %c0_20 = arith.constant 0 : index
      %20 = vector.load %arg6[%c0_19, %c0_20] : memref<1x256xf32, #tpu.memory_space<vmem>>, vector<1x256xf32>
      %21 = vector.shape_cast %20 : vector<1x256xf32> to vector<1x256xf32>
      %22 = vector.broadcast %21 : vector<1x256xf32> to vector<32x256xf32>
      %c0_21 = arith.constant 0 : index
      %c0_22 = arith.constant 0 : index
      %23 = vector.load %arg10[%c0_21, %c0_22] : memref<32x256xf32, #tpu.memory_space<vmem>>, vector<32x256xf32>
      tpu.vector_store %arg10[%c0_21, %c0_22], %22 {strides = array<i32>} : memref<32x256xf32, #tpu.memory_space<vmem>>, vector<32x256xf32>,
    } else {
    }
    %c0 = arith.constant 0 : index
    %c0_1 = arith.constant 0 : index
    %3 = vector.load %arg4[%c0, %c0_1] : memref<128x256xbf16, #tpu.memory_space<vmem>>, vector<128x256xbf16>
    %c0_2 = arith.constant 0 : index
    %c0_3 = arith.constant 0 : index
    %4 = vector.load %arg5[%c0_2, %c0_3] : memref<128x256xbf16, #tpu.memory_space<vmem>>, vector<128x256xbf16>
    %c0_4 = arith.constant 0 : index
    %c0_5 = arith.constant 0 : index
    %5 = vector.load %arg2[%c0_4, %c0_5] : memref<32x128xf32, #tpu.memory_space<vmem>>, vector<32x128xf32>
    %6 = arith.truncf %5 : vector<32x128xf32> to vector<32x128xbf16>
    %c0_6 = arith.constant 0 : index
    %c0_7 = arith.constant 0 : index
    %7 = vector.load %arg3[%c0_6, %c0_7] : memref<32x128xf32, #tpu.memory_space<vmem>>, vector<32x128xf32>
    %8 = arith.truncf %7 : vector<32x128xf32> to vector<32x128xbf16>
    %c0_8 = arith.constant 0 : index
    %c0_9 = arith.constant 0 : index
    %9 = vector.load %arg10[%c0_8, %c0_9] : memref<32x256xf32, #tpu.memory_space<vmem>>, vector<32x256xf32>
    %cst = arith.constant dense<0.000000e+00> : vector<32x256xf32>
    %10 = tpu.matmul %6, %3, %cst {dimension_numbers = #tpu.dot_dimension_numbers<[1], [0], [0], [1], [0, 0, 1, 1], [], []>} : vector<32x128xbf16>, vector<128x256xbf16>, vector<32x256xf32> -> vector<32x256xf32>
    %11 = arith.addf %9, %10 : vector<32x256xf32>
    %c0_10 = arith.constant 0 : index
    %c0_11 = arith.constant 0 : index
    %12 = vector.load %arg10[%c0_10, %c0_11] : memref<32x256xf32, #tpu.memory_space<vmem>>, vector<32x256xf32>
    tpu.vector_store %arg10[%c0_10, %c0_11], %11 {strides = array<i32>} : memref<32x256xf32, #tpu.memory_space<vmem>>, vector<32x256xf32>,
    %c0_12 = arith.constant 0 : index
    %c0_13 = arith.constant 0 : index
    %13 = vector.load %arg10[%c0_12, %c0_13] : memref<32x256xf32, #tpu.memory_space<vmem>>, vector<32x256xf32>
    %cst_14 = arith.constant dense<0.000000e+00> : vector<32x256xf32>
    %14 = tpu.matmul %8, %4, %cst_14 {dimension_numbers = #tpu.dot_dimension_numbers<[1], [0], [0], [1], [0, 0, 1, 1], [], []>} : vector<32x128xbf16>, vector<128x256xbf16>, vector<32x256xf32> -> vector<32x256xf32>
    %15 = arith.addf %13, %14 : vector<32x256xf32>
    %c0_15 = arith.constant 0 : index
    %c0_16 = arith.constant 0 : index
    %16 = vector.load %arg10[%c0_15, %c0_16] : memref<32x256xf32, #tpu.memory_space<vmem>>, vector<32x256xf32>
    tpu.vector_store %arg10[%c0_15, %c0_16], %15 {strides = array<i32>} : memref<32x256xf32, #tpu.memory_space<vmem>>, vector<32x256xf32>,
    %c0_i32_17 = arith.constant 0 : i32
    %17 = arith.cmpi eq, %arg1, %c0_i32_17 : i32
    %18 = arith.extui %17 : i1 to i32
    %c0_i32_18 = arith.constant 0 : i32
    %19 = arith.cmpi ne, %18, %c0_i32_18 : i32
    scf.if %19 {
      %c0_19 = arith.constant 0 : index
      %c0_20 = arith.constant 0 : index
      %20 = vector.load %arg10[%c0_19, %c0_20] : memref<32x256xf32, #tpu.memory_space<vmem>>, vector<32x256xf32>
      %cst_21 = arith.constant 0.000000e+00 : f32
      %21 = vector.broadcast %cst_21 : f32 to vector<32x256xf32>
      %22 = arith.maximumf %20, %21 : vector<32x256xf32>
      %c0_22 = arith.constant 0 : index
      %c0_23 = arith.constant 0 : index
      %23 = vector.load %arg7[%c0_22, %c0_23] : memref<1x256xf32, #tpu.memory_space<vmem>>, vector<1x256xf32>
      %24 = vector.broadcast %23 : vector<1x256xf32> to vector<32x256xf32>
      %25 = arith.mulf %22, %24 : vector<32x256xf32>
      %cst_24 = arith.constant dense<0.000000e+00> : vector<32xf32>
      %26 = vector.multi_reduction <add>, %25, %cst_24 [1] : vector<32x256xf32> to vector<32xf32>
      %27 = vector.shape_cast %26 : vector<32xf32> to vector<32x1xf32>
      %c0_25 = arith.constant 0 : index
      %c0_26 = arith.constant 0 : index
      %28 = memref.load %arg8[%c0_25, %c0_26] : memref<1x1xf32, #tpu.memory_space<smem>>
      %29 = vector.broadcast %28 : f32 to vector<32x1xf32>
      %30 = arith.addf %27, %29 : vector<32x1xf32>
      %31 = arith.negf %30 : vector<32x1xf32>
      %32 = math.exp %31 : vector<32x1xf32>
      %cst_27 = arith.constant 1.000000e+00 : f32
      %33 = vector.broadcast %cst_27 : f32 to vector<32x1xf32>
      %34 = arith.addf %33, %32 : vector<32x1xf32>
      %35 = arith.divf %33, %34 : vector<32x1xf32>
      %c0_28 = arith.constant 0 : index
      %c0_29 = arith.constant 0 : index
      %36 = vector.load %arg9[%c0_28, %c0_29] : memref<32x1xf32, #tpu.memory_space<vmem>>, vector<32x1xf32>
      tpu.vector_store %arg9[%c0_28, %c0_29], %35 {strides = array<i32>} : memref<32x1xf32, #tpu.memory_space<vmem>>, vector<32x1xf32>,
    } else {
    }
    return
  }
  func.func @transform_0(%arg0: i32, %arg1: i32) -> (i32, i32) {
    %c0_i32 = arith.constant 0 : i32
    return %arg0, %arg1 : i32, i32
  }
  func.func @transform_1(%arg0: i32, %arg1: i32) -> (i32, i32) {
    %c0_i32 = arith.constant 0 : i32
    return %arg0, %arg1 : i32, i32
  }
  func.func @transform_2(%arg0: i32, %arg1: i32) -> (i32, i32) {
    %c0_i32 = arith.constant 0 : i32
    %c0_i32_0 = arith.constant 0 : i32
    return %arg1, %c0_i32 : i32, i32
  }
  func.func @transform_3(%arg0: i32, %arg1: i32) -> (i32, i32) {
    %c0_i32 = arith.constant 0 : i32
    %c0_i32_0 = arith.constant 0 : i32
    return %arg1, %c0_i32 : i32, i32
  }
  func.func @transform_4(%arg0: i32, %arg1: i32) -> (i32, i32) {
    %c0_i32 = arith.constant 0 : i32
    %c0_i32_0 = arith.constant 0 : i32
    %c0_i32_1 = arith.constant 0 : i32
    return %c0_i32, %c0_i32_0 : i32, i32
  }
  func.func @transform_5(%arg0: i32, %arg1: i32) -> (i32, i32) {
    %c0_i32 = arith.constant 0 : i32
    %c0_i32_0 = arith.constant 0 : i32
    %c0_i32_1 = arith.constant 0 : i32
    return %c0_i32, %c0_i32_0 : i32, i32
  }
  func.func @transform_6(%arg0: i32, %arg1: i32) -> (i32, i32) {
    %c0_i32 = arith.constant 0 : i32
    %c0_i32_0 = arith.constant 0 : i32
    %c0_i32_1 = arith.constant 0 : i32
    return %c0_i32, %c0_i32_0 : i32, i32
  }
  func.func @transform_7(%arg0: i32, %arg1: i32) -> (i32, i32) {
    %c0_i32 = arith.constant 0 : i32
    %c0_i32_0 = arith.constant 0 : i32
    return %arg0, %c0_i32 : i32, i32
  }
}

</mosaic_0001>

<bundles_post_ra>
// kernel: a2c_forward.1
= control target key start
LH: loop header
LB: loop body
LE: loop exit
PB: predicated region body
PF: predicated region fallthrough
CT: control target
= control target key end

     0   :  { %s1266_s26 = smov 0   ;;  %s1268_s27 = smov 0   ;;  %s1518_s0 = inlined_call_operand.vmem [shape: f32[64,128], index: 0, kind: input, shape index: {}]   ;;  %s1519_s1 = inlined_call_operand.vmem [shape: f32[64,128], index: 1, kind: input, shape index: {}]   ;;  %s1520_s2 = inlined_call_operand.vmem [shape: bf16[128,256], index: 2, kind: input, shape index: {}]   ;;  %s1521_s3 = inlined_call_operand.vmem [shape: bf16[128,256], index: 3, kind: input, shape index: {}]   ;;  %s1522_s4 = inlined_call_operand.vmem [shape: f32[1,256], index: 4, kind: input, shape index: {}]   ;;  %s1523_s5 = inlined_call_operand.vmem [shape: f32[1,256], index: 5, kind: input, shape index: {}]   ;;  %s1524_s6 = inlined_call_operand.<no memory space> [shape: f32[1,1], index: 6, kind: input, shape index: {}]   ;;  %s1525_s7 = inlined_call_operand.vmem [shape: f32[64,1], index: 7, kind: output, shape index: {}]  }
   0x1   :  { %12 = sst [smem:[#allocation3]] %s1524_s6  ;;  %s1270_s28 = smov 0  }
   0x2 LB: > { %s30_s6 = sadd.s32 1, %s1217_s27  ;;  %p986_p0 = scmp.ge.s32.totalorder %s1221_s28, 1  ;;  %s1221_s28 = sphi %s1270_s28, %s18_s28   ;;  %s1217_s27 = sphi %s1268_s27, %s1527_s27   ;;  %s1213_s26 = sphi %s1266_s26, %s1526_s26  }
   0x3   : > { %p32_p1 = scmp.ge.s32.totalorder %s30_s6, 2  ;;  %p296_p2 = scmp.lt.s32.totalorder %s1221_s28, 3 }
   0x5   : > { %s1529_s6 = smov (%p32_p1, %s30_s6), 0  ;;  %p297_p3 = pnand %p986_p0, %p296_p2 }
   0x6   : > { %s987_s14 = sshll.u32 (!%p297_p3), %s1213_s26, 2  ;;  %s780_s24 = sld [smem:[#allocation3]] (!%p297_p3) }
   0x7   : > { %300 = sbr.rel (%p297_p3) target bundleno = 359 (0x167), region = 48  ;;  %p352_p4 = scmp.lt.s32.totalorder (!%p297_p3), %s987_s14, 7 }
   0xc   : > { %v1051_v0 = vld [vmem:[%s1520_s2 + $0x70] sm:$0xf]  ;;  %v1142_v1 = vld [vmem:[%s1520_s2 + $0x74] sm:$0xf0]  ;;  %v1141_v2 = vld [vmem:[%s1520_s2 + $0x74] sm:$0xf] }
   0xd   : > { %v1052_v3 = vor.u32 %v1142_v1, %v1051_v0  ;;  %v1053_v4 = vld [vmem:[%s1520_s2 + $0x78] sm:$0xf0]  ;;  %v1115_v5 = vld [vmem:[%s1521_s3 + $0x70] sm:$0xf]  ;;  %v1158_v6 = vld [vmem:[%s1521_s3 + $0x74] sm:$0xf0] }
   0xe   : > { %v1056_v7 = vor.u32 %v1141_v2, %v1053_v4  ;;  %v1116_v8 = vor.u32 %v1158_v6, %v1115_v5  ;;  %v1157_v9 = vld [vmem:[%s1521_s3 + $0x74] sm:$0xf]  ;;  %v1117_v10 = vld [vmem:[%s1521_s3 + $0x78] sm:$0xf0]  ;;  %v1043_v11 = vld [vmem:[%s1520_s2 + $0x60] sm:$0xf] }
   0xf   : > { %539 = vmatpush.bf16.msra.mxu0 %v1052_v3  ;;  %v1120_v12 = vor.u32 %v1157_v9, %v1117_v10  ;;  %v1140_v13 = vld [vmem:[%s1520_s2 + $0x64] sm:$0xf0]  ;;  %v1139_v14 = vld [vmem:[%s1520_s2 + $0x64] sm:$0xf]  ;;  %v1045_v15 = vld [vmem:[%s1520_s2 + $0x68] sm:$0xf0] }
  0x10   : > { %558 = vmatpush.bf16.msra.mxu1 %v1056_v7  ;;  %681 = vmatpush.bf16.msra.mxu2 %v1116_v8  ;;  %v1044_v16 = vor.u32 %v1140_v13, %v1043_v11  ;;  %v1048_v17 = vor.u32 %v1139_v14, %v1045_v15  ;;  %v1107_v18 = vld [vmem:[%s1521_s3 + $0x60] sm:$0xf]  ;;  %v1156_v19 = vld [vmem:[%s1521_s3 + $0x64] sm:$0xf0]  ;;  %v1155_v20 = vld [vmem:[%s1521_s3 + $0x64] sm:$0xf] }
  0x11   : > { %700 = vmatpush.bf16.msra.mxu3 %v1120_v12  ;;  %v1108_v21 = vor.u32 %v1156_v19, %v1107_v18  ;;  %v1109_v22 = vld [vmem:[%s1521_s3 + $0x68] sm:$0xf0]  ;;  %v1035_v23 = vld [vmem:[%s1520_s2 + $0x50] sm:$0xf]  ;;  %v1138_v24 = vld [vmem:[%s1520_s2 + $0x54] sm:$0xf0] }
  0x12   : > { %v1112_v25 = vor.u32 %v1155_v20, %v1109_v22  ;;  %v1137_v26 = vld [vmem:[%s1520_s2 + $0x54] sm:$0xf]  ;;  %v1037_v27 = vld [vmem:[%s1520_s2 + $0x58] sm:$0xf0]  ;;  %v1099_v28 = vld [vmem:[%s1521_s3 + $0x50] sm:$0xf]  ;;  %v1036_v29 = vor.u32 %v1138_v24, %v1035_v23 }
  0x13   : > { %540 = vmatpush.bf16.msra.mxu0 %v1044_v16  ;;  %v1154_v30 = vld [vmem:[%s1521_s3 + $0x54] sm:$0xf0]  ;;  %v1153_v31 = vld [vmem:[%s1521_s3 + $0x54] sm:$0xf]  ;;  %v1101_v32 = vld [vmem:[%s1521_s3 + $0x58] sm:$0xf0]  ;;  %v1040_v33 = vor.u32 %v1137_v26, %v1037_v27 }
  0x14   : > { %559 = vmatpush.bf16.msra.mxu1 %v1048_v17  ;;  %682 = vmatpush.bf16.msra.mxu2 %v1108_v21  ;;  %v1100_v34 = vor.u32 %v1154_v30, %v1099_v28  ;;  %v1027_v35 = vld [vmem:[%s1520_s2 + $0x40] sm:$0xf]  ;;  %v1136_v36 = vld [vmem:[%s1520_s2 + $0x44] sm:$0xf0]  ;;  %v1135_v37 = vld [vmem:[%s1520_s2 + $0x44] sm:$0xf]  ;;  %v1104_v38 = vor.u32 %v1153_v31, %v1101_v32 }
  0x15   : > { %701 = vmatpush.bf16.msra.mxu3 %v1112_v25  ;;  %v1029_v39 = vld [vmem:[%s1520_s2 + $0x48] sm:$0xf0]  ;;  %v1091_v40 = vld [vmem:[%s1521_s3 + $0x40] sm:$0xf]  ;;  %v1152_v41 = vld [vmem:[%s1521_s3 + $0x44] sm:$0xf0]  ;;  %v1028_v44 = vor.u32 %v1136_v36, %v1027_v35 }
  0x16   : > { %v1151_v42 = vld [vmem:[%s1521_s3 + $0x44] sm:$0xf]  ;;  %v1093_v43 = vld [vmem:[%s1521_s3 + $0x48] sm:$0xf0]  ;;  %v1032_v45 = vor.u32 %v1135_v37, %v1029_v39  ;;  %v1092_v46 = vor.u32 %v1152_v41, %v1091_v40  ;;  %v1019_v47 = vld [vmem:[%s1520_s2 + $0x30] sm:$0xf] }
  0x17   : > { %541 = vmatpush.bf16.msra.mxu0 %v1036_v29  ;;  %v1134_v48 = vld [vmem:[%s1520_s2 + $0x34] sm:$0xf0]  ;;  %v1133_v49 = vld [vmem:[%s1520_s2 + $0x34] sm:$0xf]  ;;  %v1096_v50 = vor.u32 %v1151_v42, %v1093_v43  ;;  %v1021_v51 = vld [vmem:[%s1520_s2 + $0x38] sm:$0xf0] }
  0x18   : > { %560 = vmatpush.bf16.msra.mxu1 %v1040_v33  ;;  %683 = vmatpush.bf16.msra.mxu2 %v1100_v34  ;;  %v1083_v52 = vld [vmem:[%s1521_s3 + $0x30] sm:$0xf]  ;;  %v1150_v53 = vld [vmem:[%s1521_s3 + $0x34] sm:$0xf0]  ;;  %v1149_v54 = vld [vmem:[%s1521_s3 + $0x34] sm:$0xf]  ;;  %v1020_v56 = vor.u32 %v1134_v48, %v1019_v47  ;;  %v1024_v57 = vor.u32 %v1133_v49, %v1021_v51 }
  0x19   : > { %702 = vmatpush.bf16.msra.mxu3 %v1104_v38  ;;  %v1085_v55 = vld [vmem:[%s1521_s3 + $0x38] sm:$0xf0]  ;;  %v1084_v58 = vor.u32 %v1150_v53, %v1083_v52  ;;  %v1011_v59 = vld [vmem:[%s1520_s2 + $0x20] sm:$0xf]  ;;  %v1132_v60 = vld [vmem:[%s1520_s2 + $0x24] sm:$0xf0] }
  0x1a   : > { %v1131_v61 = vld [vmem:[%s1520_s2 + $0x24] sm:$0xf]  ;;  %v1088_v62 = vor.u32 %v1149_v54, %v1085_v55  ;;  %v1013_v63 = vld [vmem:[%s1520_s2 + $0x28] sm:$0xf0]  ;;  %v1075_v0 = vld [vmem:[%s1521_s3 + $0x20] sm:$0xf]  ;;  %v1012_v4 = vor.u32 %v1132_v60, %v1011_v59 }
  0x1b   : > { %542 = vmatpush.bf16.msra.mxu0 %v1028_v44  ;;  %v1148_v1 = vld [vmem:[%s1521_s3 + $0x24] sm:$0xf0]  ;;  %v1147_v2 = vld [vmem:[%s1521_s3 + $0x24] sm:$0xf]  ;;  %v1077_v3 = vld [vmem:[%s1521_s3 + $0x28] sm:$0xf0]  ;;  %v1016_v6 = vor.u32 %v1131_v61, %v1013_v63 }
  0x1c   : > { %561 = vmatpush.bf16.msra.mxu1 %v1032_v45  ;;  %684 = vmatpush.bf16.msra.mxu2 %v1092_v46  ;;  %v1003_v5 = vld [vmem:[%s1520_s2 + $0x10] sm:$0xf]  ;;  %v1076_v7 = vor.u32 %v1148_v1, %v1075_v0  ;;  %v1130_v8 = vld [vmem:[%s1520_s2 + $0x14] sm:$0xf0]  ;;  %v1129_v9 = vld [vmem:[%s1520_s2 + $0x14] sm:$0xf]  ;;  %v1080_v11 = vor.u32 %v1147_v2, %v1077_v3 }
  0x1d   : > { %703 = vmatpush.bf16.msra.mxu3 %v1096_v50  ;;  %v1005_v10 = vld [vmem:[%s1520_s2 + $0x18] sm:$0xf0]  ;;  %v1067_v12 = vld [vmem:[%s1521_s3 + $0x10] sm:$0xf]  ;;  %v1146_v13 = vld [vmem:[%s1521_s3 + $0x14] sm:$0xf0]  ;;  %v1004_v16 = vor.u32 %v1130_v8, %v1003_v5 }
  0x1e   : > { %v1145_v14 = vld [vmem:[%s1521_s3 + $0x14] sm:$0xf]  ;;  %v1069_v15 = vld [vmem:[%s1521_s3 + $0x18] sm:$0xf0]  ;;  %v995_v17 = vld [vmem:[%s1520_s2] sm:$0xf]  ;;  %v1008_v18 = vor.u32 %v1129_v9, %v1005_v10  ;;  %v1068_v19 = vor.u32 %v1146_v13, %v1067_v12 }
  0x1f   : > { %543 = vmatpush.bf16.msra.mxu0 %v1020_v56  ;;  %v1128_v20 = vld [vmem:[%s1520_s2 + $0x4] sm:$0xf0]  ;;  %v1127_v21 = vld [vmem:[%s1520_s2 + $0x4] sm:$0xf]  ;;  %s1531_s14 = smov (!%p352_p4, %s987_s14), 7  ;;  %v1072_v22 = vor.u32 %v1145_v14, %v1069_v15  ;;  %vm862_vm2 = vcmask 7168  }
  0x20   : > { %562 = vmatpush.bf16.msra.mxu1 %v1024_v57  ;;  %685 = vmatpush.bf16.msra.mxu2 %v1084_v58  ;;  %v997_v23 = vld [vmem:[%s1520_s2 + $0x8] sm:$0xf0]  ;;  %v1059_v24 = vld [vmem:[%s1521_s3] sm:$0xf]  ;;  %v1144_v25 = vld [vmem:[%s1521_s3 + $0x4] sm:$0xf0]  ;;  %v996_v28 = vor.u32 %v1128_v20, %v995_v17 }
  0x21   : > { %704 = vmatpush.bf16.msra.mxu3 %v1088_v62  ;;  %v1143_v26 = vld [vmem:[%s1521_s3 + $0x4] sm:$0xf]  ;;  %v1061_v27 = vld [vmem:[%s1521_s3 + $0x8] sm:$0xf0]  ;;  %s1479_s15 = sshll.u32 %s1531_s14, 3  ;;  %v1000_v29 = vor.u32 %v1127_v21, %v997_v23  ;;  %v1060_v30 = vor.u32 %v1144_v25, %v1059_v24 }
  0x22   : > { %s358_s18 = scalar_lea.vmem %s1518_s0, %s1479_s15  ;;  %s367_s26 = scalar_lea.vmem %s1519_s1, %s1479_s15  ;;  %v1064_v33 = vor.u32 %v1143_v26, %v1061_v27  ;;  %v393_v44 = vld [vmem:[%s1522_s4] sm:$0x3] }
  0x23   : > { %544 = vmatpush.bf16.msra.mxu0 %v1012_v4  ;;  %v439_v31 = vld [vmem:[%s358_s18] sm:$0xff]  ;;  %v440_v32 = vld [vmem:[%s358_s18 + $0x8] sm:$0xff]  ;;  %v441_v38 = vld [vmem:[%s358_s18 + $0x10] sm:$0xff]  ;;  %v395_v45 = vperm.slane %v393_v44, 0  ;;  %v396_v47 = vperm.slane %v393_v44, 1  ;;  %s1499_s30 = scalar_lea.vmem %s1525_s7, %s1479_s15 }
  0x24   : > { %563 = vmatpush.bf16.msra.mxu1 %v1016_v6  ;;  %686 = vmatpush.bf16.msra.mxu2 %v1076_v7  ;;  %v445_v34 = vld [vmem:[%s367_s26] sm:$0xff]  ;;  %v446_v35 = vld [vmem:[%s367_s26 + $0x8] sm:$0xff]  ;;  %v443_v36 = vpack.c.bf16 %v440_v32, %v439_v31  ;;  %v442_v39 = vld [vmem:[%s358_s18 + $0x18] sm:$0xff] }
  0x25   : > { %705 = vmatpush.bf16.msra.mxu3 %v1080_v11  ;;  %v449_v37 = vpack.c.bf16 %v446_v35, %v445_v34  ;;  %v447_v40 = vld [vmem:[%s367_s26 + $0x10] sm:$0xff]  ;;  %v448_v41 = vld [vmem:[%s367_s26 + $0x18] sm:$0xff]  ;;  %v444_v42 = vpack.c.bf16 %v442_v39, %v441_v38  ;;  %v754_v51 = vld [vmem:[%s1523_s5] sm:$0x3]  ;;  %v781_v38 = vstv %s780_s24 }
  0x26   : > { %v450_v43 = vpack.c.bf16 %v448_v41, %v447_v40  ;;  %v756_v56 = vperm.slane %v754_v51, 0  ;;  %v757_v59 = vperm.slane %v754_v51, 1 }
  0x27   : > { %545 = vmatpush.bf16.msra.mxu0 %v1004_v16 }
  0x28   : > { %564 = vmatpush.bf16.msra.mxu1 %v1008_v18  ;;  %687 = vmatpush.bf16.msra.mxu2 %v1068_v19 }
  0x29   : > { %706 = vmatpush.bf16.msra.mxu3 %v1072_v22 }
  0x2b   : > { %546 = vmatpush.bf16.msra.mxu0 %v996_v28 }
  0x2c   : > { %565 = vmatpush.bf16.msra.mxu1 %v1000_v29  ;;  %688 = vmatpush.bf16.msra.mxu2 %v1060_v30 }
  0x2d   : > { %707 = vmatpush.bf16.msra.mxu3 %v1064_v33 }
  0x2e   : > { %547 = vmatmul.bf16.vlgmr.msra.gmra.mxu0 %v443_v36 }
  0x2f   : > { %566 = vmatmul.bf16.vlgmr.msra.gmra.mxu1 %v443_v36  ;;  %689 = vmatmul.bf16.vlgmr.msra.gmra.mxu2 %v449_v37 }
  0x30   : > { %708 = vmatmul.bf16.vlgmr.msra.gmra.mxu3 %v449_v37 }
  0x3e   : > { %552 = vmatmul.bf16.gmra.mxu0 %v444_v42 }
  0x3f   : > { %571 = vmatmul.bf16.gmra.mxu1 %v444_v42  ;;  %694 = vmatmul.bf16.gmra.mxu2 %v450_v43 }
  0x40   : > { %713 = vmatmul.bf16.gmra.mxu3 %v450_v43 }
  0xab   : > { %v548_v46 = vpop.f32.mrf.mxu0 }
  0xac   : > { %v567_v48 = vpop.f32.mrf.mxu1  ;;  %v577_v49 = vadd.f32 %v548_v46, %v395_v45 }
  0xad   : > { %v578_v50 = vadd.f32 %v567_v48, %v396_v47 }
  0xb2   : > { %v690_v52 = vpop.f32.mrf.mxu2 }
  0xb3   : > { %v719_v53 = vadd.f32 %v690_v52, %v577_v49  ;;  %v709_v54 = vpop.f32.mrf.mxu3  ;;  %v550_v55 = vpop.f32.mrf.mxu0 }
  0xb4   : > { %v720_v57 = vadd.f32 %v709_v54, %v578_v50  ;;  %v569_v58 = vpop.f32.mrf.mxu1  ;;  %v579_v0 = vadd.f32 %v550_v55, %v395_v45 }
  0xb5   : > { %v746_v60 = vmax.f32 %v719_v53, 0.0  ;;  %v580_v1 = vadd.f32 %v569_v58, %v396_v47 }
  0xb6   : > { %v747_v61 = vmax.f32 %v720_v57, 0.0 }
  0xb7   : > { %v760_v62 = vmul.f32 %v756_v56, %v746_v60 }
  0xb8   : > { %v761_v63 = vmul.f32 %v757_v59, %v747_v61 }
  0xba   : > { %v692_v2 = vpop.f32.mrf.mxu2  ;;  %v768_v3 = vadd.f32 %v761_v63, %v760_v62 }
  0xbb   : > { %v721_v4 = vadd.f32 %v692_v2, %v579_v0  ;;  %v711_v5 = vpop.f32.mrf.mxu3  ;;  %v553_v7 = vpop.f32.mrf.mxu0 }
  0xbc   : > { %v722_v6 = vadd.f32 %v711_v5, %v580_v1  ;;  %769 = vadd.xlane.f32.xlu0 %v768_v3  ;;  %v572_v9 = vpop.f32.mrf.mxu1  ;;  %v581_v12 = vadd.f32 %v553_v7, %v395_v45 }
  0xbd   : > { %v748_v8 = vmax.f32 %v721_v4, 0.0  ;;  %v582_v14 = vadd.f32 %v572_v9, %v396_v47 }
  0xbe   : > { %v749_v10 = vmax.f32 %v722_v6, 0.0 }
  0xbf   : > { %v762_v11 = vmul.f32 %v756_v56, %v748_v8 }
  0xc0   : > { %v763_v13 = vmul.f32 %v757_v59, %v749_v10 }
  0xc2   : > { %v695_v15 = vpop.f32.mrf.mxu2  ;;  %v771_v16 = vadd.f32 %v763_v13, %v762_v11 }
  0xc3   : > { %v723_v17 = vadd.f32 %v695_v15, %v581_v12  ;;  %v714_v18 = vpop.f32.mrf.mxu3  ;;  %v555_v22 = vpop.f32.mrf.mxu0 }
  0xc4   : > { %v724_v19 = vadd.f32 %v714_v18, %v582_v14  ;;  %772 = vadd.xlane.f32.xlu0 %v771_v16  ;;  %v574_v23 = vpop.f32.mrf.mxu1  ;;  %v583_v26 = vadd.f32 %v555_v22, %v395_v45 }
  0xc5   : > { %v750_v20 = vmax.f32 %v723_v17, 0.0  ;;  %v584_v27 = vadd.f32 %v574_v23, %v396_v47 }
  0xc6   : > { %v751_v21 = vmax.f32 %v724_v19, 0.0 }
  0xc7   : > { %v764_v24 = vmul.f32 %v756_v56, %v750_v20 }
  0xc8   : > { %v765_v25 = vmul.f32 %v757_v59, %v751_v21 }
  0xca   : > { %v697_v28 = vpop.f32.mrf.mxu2  ;;  %v774_v29 = vadd.f32 %v765_v25, %v764_v24 }
  0xcb   : > { %v725_v30 = vadd.f32 %v697_v28, %v583_v26  ;;  %v716_v31 = vpop.f32.mrf.mxu3 }
  0xcc   : > { %v726_v32 = vadd.f32 %v716_v31, %v584_v27  ;;  %775 = vadd.xlane.f32.xlu1 %v774_v29 }
  0xcd   : > { %v752_v33 = vmax.f32 %v725_v30, 0.0 }
  0xce   : > { %v753_v34 = vmax.f32 %v726_v32, 0.0 }
  0xcf   : > { %v766_v35 = vmul.f32 %v756_v56, %v752_v33 }
  0xd0   : > { %v767_v36 = vmul.f32 %v757_v59, %v753_v34 }
  0xd2   : > { %v777_v37 = vadd.f32 %v767_v36, %v766_v35 }
  0xd4   : > { %778 = vadd.xlane.f32.xlu1 %v777_v37 }
 0x12f   : > { %v770_v39 = vpop.xlane.xlu0 %769 }
 0x130   : > { %v782_v40 = vadd.f32 %v781_v38, %v770_v39 }
 0x132   : > { %v1121_v41 = vmul.f32 -1.442695, %v782_v40 }
 0x134   : > { %1183 = vpow2.f32 %v1121_v41 }
 0x137   : > { %v773_v42 = vpop.xlane.xlu0 %772 }
 0x138   : > { %v783_v43 = vadd.f32 %v781_v38, %v773_v42 }
 0x13a   : > { %v1184_v44 = vpop.eup %1183  ;;  %v1122_v45 = vmul.f32 -1.442695, %v783_v43 }
 0x13b   : > { %v798_v46 = vadd.f32 1.0, %v1184_v44 }
 0x13c   : > { %1185 = vpow2.f32 %v1122_v45 }
 0x13d   : > { %1187 = vrcp.f32 %v798_v46  ;;  %v813_v55 = vand.u32 2147483648, %v798_v46  ;;  %v811_v58 = vand.u32 2147483647, %v798_v46  ;;  %vm807_vm1 = vweird.f32 %v798_v46 }
 0x13f   : > { %v776_v47 = vpop.xlane.xlu1 %775  ;;  %v814_v0 = vor.u32 1.1754944e-38, %v813_v55  ;;  %vm812_vm4 = vcmp.eq.f32.partialorder %v811_v58, 8.507059e+37 }
 0x140   : > { %v784_v48 = vadd.f32 %v781_v38, %v776_v47 }
 0x142   : > { %v1186_v49 = vpop.eup %1185  ;;  %v1123_v50 = vmul.f32 -1.442695, %v784_v48 }
 0x143   : > { %v1188_v51 = vpop.eup %1187  ;;  %v799_v52 = vadd.f32 1.0, %v1186_v49 }
 0x144   : > { %v803_v53 = vmul.f32 %v1188_v51, %v798_v46  ;;  %1189 = vpow2.f32 %v1123_v50  ;;  %vm808_vm0 = vweird.f32 %v1188_v51 }
 0x145   : > { %1191 = vrcp.f32 %v799_v52  ;;  %vm809_vm3 = vmor %vm807_vm1, %vm808_vm0  ;;  %v828_v6 = vand.u32 2147483648, %v799_v52  ;;  %v826_v8 = vand.u32 2147483647, %v799_v52  ;;  %vm822_vm6 = vweird.f32 %v799_v52 }
 0x146   : > { %v804_v54 = vsub.f32 1.0, %v803_v53 }
 0x147   : > { %v779_v56 = vpop.xlane.xlu1 %778  ;;  %v829_v12 = vor.u32 1.1754944e-38, %v828_v6  ;;  %vm827_vm8 = vcmp.eq.f32.partialorder %v826_v8, 8.507059e+37 }
 0x148   : > { %v805_v57 = vmul.f32 %v1188_v51, %v804_v54  ;;  %v785_v59 = vadd.f32 %v781_v38, %v779_v56 }
 0x14a   : > { %v1190_v60 = vpop.eup %1189  ;;  %v806_v61 = vadd.f32 %v1188_v51, %v805_v57  ;;  %v1124_v62 = vmul.f32 -1.442695, %v785_v59 }
 0x14b   : > { %v1192_v63 = vpop.eup %1191  ;;  %v800_v1 = vadd.f32 1.0, %v1190_v60 }
 0x14c   : > { %v810_v2 = vsel %vm809_vm3, %v1188_v51, %v806_v61  ;;  %v818_v3 = vmul.f32 %v1192_v63, %v799_v52  ;;  %1193 = vpow2.f32 %v1124_v62  ;;  %vm823_vm5 = vweird.f32 %v1192_v63 }
 0x14d   : > { %v815_v4 = vsel %vm812_vm4, %v814_v0, %v810_v2  ;;  %1195 = vrcp.f32 %v800_v1  ;;  %vm824_vm7 = vmor %vm822_vm6, %vm823_vm5  ;;  %v843_v18 = vand.u32 2147483648, %v800_v1  ;;  %v841_v20 = vand.u32 2147483647, %v800_v1 }
 0x14e   : > { %863 = vst.msk [vmem:[%s1499_s30] sm:$0xff] %vm862_vm2, %v815_v4  ;;  %v819_v5 = vsub.f32 1.0, %v818_v3  ;;  %vm837_vm10 = vweird.f32 %v800_v1 }
 0x14f   : > { %v844_v23 = vor.u32 1.1754944e-38, %v843_v18  ;;  %vm842_vm12 = vcmp.eq.f32.partialorder %v841_v20, 8.507059e+37 }
 0x150   : > { %v820_v7 = vmul.f32 %v1192_v63, %v819_v5 }
 0x152   : > { %v1194_v9 = vpop.eup %1193  ;;  %v821_v10 = vadd.f32 %v1192_v63, %v820_v7 }
 0x153   : > { %v1196_v11 = vpop.eup %1195  ;;  %v801_v13 = vadd.f32 1.0, %v1194_v9 }
 0x154   : > { %v825_v14 = vsel %vm824_vm7, %v1192_v63, %v821_v10  ;;  %v833_v15 = vmul.f32 %v1196_v11, %v800_v1  ;;  %vm838_vm9 = vweird.f32 %v1196_v11 }
 0x155   : > { %v830_v16 = vsel %vm827_vm8, %v829_v12, %v825_v14  ;;  %1197 = vrcp.f32 %v801_v13  ;;  %vm839_vm11 = vmor %vm837_vm10, %vm838_vm9  ;;  %v858_v28 = vand.u32 2147483648, %v801_v13  ;;  %v856_v30 = vand.u32 2147483647, %v801_v13 }
 0x156   : > { %864 = vst.msk [vmem:[%s1499_s30 + $0x8] sm:$0xff] %vm862_vm2, %v830_v16  ;;  %v834_v17 = vsub.f32 1.0, %v833_v15  ;;  %vm852_vm14 = vweird.f32 %v801_v13 }
 0x157   : > { %v859_v32 = vor.u32 1.1754944e-38, %v858_v28  ;;  %vm857_vm0 = vcmp.eq.f32.partialorder %v856_v30, 8.507059e+37 }
 0x158   : > { %v835_v19 = vmul.f32 %v1196_v11, %v834_v17 }
 0x15a   : > { %v836_v21 = vadd.f32 %v1196_v11, %v835_v19 }
 0x15b   : > { %v1198_v22 = vpop.eup %1197 }
 0x15c   : > { %v840_v24 = vsel %vm839_vm11, %v1196_v11, %v836_v21  ;;  %v848_v25 = vmul.f32 %v1198_v22, %v801_v13  ;;  %vm853_vm13 = vweird.f32 %v1198_v22 }
 0x15d   : > { %v845_v26 = vsel %vm842_vm12, %v844_v23, %v840_v24  ;;  %vm854_vm15 = vmor %vm852_vm14, %vm853_vm13 }
 0x15e   : > { %865 = vst.msk [vmem:[%s1499_s30 + $0x10] sm:$0xff] %vm862_vm2, %v845_v26  ;;  %v849_v27 = vsub.f32 1.0, %v848_v25 }
 0x160   : > { %v850_v29 = vmul.f32 %v1198_v22, %v849_v27 }
 0x162   : > { %v851_v31 = vadd.f32 %v1198_v22, %v850_v29 }
 0x164   : > { %v855_v33 = vsel %vm854_vm15, %v1198_v22, %v851_v31 }
 0x165   : > { %v860_v34 = vsel %vm857_vm0, %v859_v32, %v855_v33 }
 0x166   : > { %866 = vst.msk [vmem:[%s1499_s30 + $0x18] sm:$0xff] %vm862_vm2, %v860_v34 }
 0x167 PF: > { %s18_s28 = sadd.s32 1, %s1221_s28   ;;  %s1526_s26 = smov %s1217_s27 }
 0x168   : > { %p15_p5 = scmp.ge.s32.totalorder %s18_s28, 4   ;;  %s1527_s27 = smov %s1529_s6 }
 0x16a   :  { %17 = sbr.rel (!%p15_p5) target bundleno = 2 (0x2), region = 95 }

</bundles_post_ra>
